<compile_context>
chip_gen: v6e
topology: v6e:2x2x1
jax: 0.10.0
libtpu: 0.0.40
codegen_flags: <defaults>
</compile_context>

<pallas_src>
import functools

import jax
import jax.numpy as jnp
from jax import lax
from jax.experimental import pallas as pl
from jax.experimental.pallas import tpu as pltpu


def nerf_render_kernel(o_ref, d_ref, w1_ref, b1_ref, w2_ref, b2_ref,
                       w3_ref, b3_ref, out_ref, *, num_samples, near, far):
    """One ray tile: sample generation + batched MLP field + compositing.

    o_ref / d_ref : (3, TB)  f32  ray origins / directions (rays on lanes)
    w*_ref        : bf16 transposed weights (H, 3), (H, H), (4, H)
    b*_ref        : f32 biases (H, 1), (H, 1), (4, 1)
    out_ref       : (3, TB)  f32  composited RGB (rays on lanes)
    """
    TB = o_ref.shape[1]
    S = num_samples
    dz = (far - near) / S                        # uniform segment length

    origins = o_ref[...]                         # (3, TB)
    dirs = d_ref[...]                            # (3, TB)

    # Sample locations at segment midpoints, batched over samples along the
    # lane axis: column s*TB + r holds sample s of ray r.
    pts = jnp.concatenate(
        [origins + dirs * (near + dz * (s + 0.5)) for s in range(S)],
        axis=1)                                  # (3, S*TB) f32

    bf16 = jnp.bfloat16
    f32 = jnp.float32

    # Neural field MLP 3 -> H -> H -> 4: single bf16 MXU pass over all samples.
    h = jnp.dot(w1_ref[...], pts.astype(bf16),
                preferred_element_type=f32) + b1_ref[...]
    h = jnp.maximum(h, 0.0)
    h = jnp.dot(w2_ref[...], h.astype(bf16),
                preferred_element_type=f32) + b2_ref[...]
    h = jnp.maximum(h, 0.0)
    o = jnp.dot(w3_ref[...], h.astype(bf16),
                preferred_element_type=f32) + b3_ref[...]           # (4, S*TB)

    # Activation mapping + alpha, computed once on the full lane-dense block.
    sigma = jnp.maximum(o[3:4, :], 0.0)          # (1, S*TB) ReLU density
    colors = jax.nn.sigmoid(o[0:3, :])           # (3, S*TB) sigmoid RGB
    alphas = 1.0 - jnp.exp(-sigma * dz)          # (1, S*TB)

    # Front-to-back compositing: weight_s = alpha_s * prod_{k<s}(1 - alpha_k + 1e-10).
    # Each slice below is a 128-lane-aligned full-vreg window (no masked work).
    T = jnp.ones((1, TB), f32)                   # exclusive transmittance
    rgb = jnp.zeros((3, TB), f32)
    for s in range(S):
        a = alphas[:, s * TB:(s + 1) * TB]       # (1, TB)
        c = colors[:, s * TB:(s + 1) * TB]       # (3, TB)
        rgb = rgb + (a * T) * c
        T = T * (1.0 - a + 1e-10)

    out_ref[...] = rgb


def nerf_forward(origins, directions, params, *, near, far, num_samples,
                 ray_tile=128):
    """Pallas wrapper: transposed rays-on-lanes layout, rays tiled on the grid."""
    B = origins.shape[0]
    assert B % ray_tile == 0 and ray_tile % 128 == 0
    w1, b1, w2, b2, w3, b3 = params

    # Hoisted, grid-invariant prep: transpose to rays-on-lanes and pre-cast the
    # (tiny) weights to bf16 so the kernel does a single-pass MXU matmul.
    o_t = origins.T                               # (3, B)
    d_t = directions.T                            # (3, B)
    w1t = w1.T.astype(jnp.bfloat16)               # (H, 3)
    w2t = w2.T.astype(jnp.bfloat16)               # (H, H)
    w3t = w3.T.astype(jnp.bfloat16)               # (4, H)
    b1t = b1.reshape(-1, 1).astype(jnp.float32)   # (H, 1)
    b2t = b2.reshape(-1, 1).astype(jnp.float32)   # (H, 1)
    b3t = b3.reshape(-1, 1).astype(jnp.float32)   # (4, 1)

    kernel = functools.partial(nerf_render_kernel, num_samples=num_samples,
                               near=float(near), far=float(far))

    def full_spec(arr):
        return pl.BlockSpec(arr.shape, lambda i: (0, 0))

    out_t = pl.pallas_call(
        kernel,
        out_shape=jax.ShapeDtypeStruct((3, B), jnp.float32),
        grid_spec=pltpu.PrefetchScalarGridSpec(
            num_scalar_prefetch=0,
            grid=(B // ray_tile,),
            in_specs=[
                pl.BlockSpec((3, ray_tile), lambda i: (0, i)),   # origins^T
                pl.BlockSpec((3, ray_tile), lambda i: (0, i)),   # directions^T
                full_spec(w1t), full_spec(b1t),
                full_spec(w2t), full_spec(b2t),
                full_spec(w3t), full_spec(b3t),
            ],
            out_specs=pl.BlockSpec((3, ray_tile), lambda i: (0, i)),
        ),
        compiler_params=pltpu.CompilerParams(
            dimension_semantics=("parallel",)),
    )(o_t, d_t, w1t, b1t, w2t, b2t, w3t, b3t)

    return out_t.T                                # (B, 3)


def nerf_reference(origins, directions, params, *, near, far, num_samples):
    """Pure-JAX reference mirroring the PyTorch module (same bf16 matmul casts)."""
    w1, b1, w2, b2, w3, b3 = params
    B = origins.shape[0]
    S = num_samples
    dz = (far - near) / S
    # Midpoints of uniform segments between near and far (same arithmetic as kernel).
    mids = jnp.array([near + dz * (s + 0.5) for s in range(S)], dtype=jnp.float32)
    pts = origins[:, None, :] + directions[:, None, :] * mids[None, :, None]
    x = pts.reshape(-1, 3)
    bf = jnp.bfloat16
    f32 = jnp.float32
    h = jnp.maximum(jnp.dot(x.astype(bf), w1.astype(bf),
                            preferred_element_type=f32) + b1, 0.0)
    h = jnp.maximum(jnp.dot(h.astype(bf), w2.astype(bf),
                            preferred_element_type=f32) + b2, 0.0)
    o = (jnp.dot(h.astype(bf), w3.astype(bf),
                 preferred_element_type=f32) + b3).reshape(B, S, 4)
    sigma = jnp.maximum(o[..., 3], 0.0)
    colors = jax.nn.sigmoid(o[..., :3])
    alphas = 1.0 - jnp.exp(-sigma * dz)
    T = jnp.cumprod(1.0 - alphas + 1e-10, axis=-1)
    T = jnp.concatenate([jnp.ones_like(T[..., :1]), T[..., :-1]], axis=-1)
    weights = alphas * T
    return jnp.sum(weights[..., None] * colors, axis=-2)


def init_params(key, hidden):
    """Deterministic synthetic field parameters (3 -> H -> H -> 4 MLP)."""
    ks = jax.random.split(key, 6)

    def dense(kw, kb, fan_in, fan_out):
        scale = 1.0 / jnp.sqrt(jnp.float32(fan_in))
        w = jax.random.normal(kw, (fan_in, fan_out), jnp.float32) * scale
        b = jax.random.normal(kb, (1, fan_out), jnp.float32) * 0.1
        return w, b

    w1, b1 = dense(ks[0], ks[1], 3, hidden)
    w2, b2 = dense(ks[2], ks[3], hidden, hidden)
    w3, b3 = dense(ks[4], ks[5], hidden, 4)
    return (w1, b1, w2, b2, w3, b3)


if __name__ == "__main__":
    B = 256           # rays: 2 grid steps of 128 (keeps both v7x TCs busy)
    S = 8             # cfg.num_samples
    H = 32            # field hidden width
    NEAR, FAR = 2.0, 6.0

    key = jax.random.PRNGKey(0)
    k_o, k_d, k_p = jax.random.split(key, 3)
    origins = jax.random.normal(k_o, (B, 3), jnp.float32)
    directions = jax.random.normal(k_d, (B, 3), jnp.float32)
    directions = directions / jnp.linalg.norm(directions, axis=-1,
                                              keepdims=True)
    params = init_params(k_p, H)

    rgb = nerf_forward(origins, directions, params,
                       near=NEAR, far=FAR, num_samples=S, ray_tile=128)
    rgb = jax.block_until_ready(rgb)

    ref = nerf_reference(origins, directions, params,
                         near=NEAR, far=FAR, num_samples=S)
    err = float(jnp.max(jnp.abs(rgb - ref)))
    assert rgb.shape == (B, 3) and rgb.dtype == jnp.float32
    assert err < 1e-3, f"max abs error too large: {err}"

    print("KERNEL_OK")
</pallas_src>

<mosaic_0001>
module attributes {stable_mosaic.version = 11 : i64} {
  func.func @nerf_render_kernel(%arg0: i32, %arg1: memref<3x128xf32, #tpu.memory_space<vmem>>, %arg2: memref<3x128xf32, #tpu.memory_space<vmem>>, %arg3: memref<32x3xbf16, #tpu.memory_space<vmem>>, %arg4: memref<32x1xf32, #tpu.memory_space<vmem>>, %arg5: memref<32x32xbf16, #tpu.memory_space<vmem>>, %arg6: memref<32x1xf32, #tpu.memory_space<vmem>>, %arg7: memref<4x32xbf16, #tpu.memory_space<vmem>>, %arg8: memref<4x1xf32, #tpu.memory_space<vmem>>, %arg9: memref<3x128xf32, #tpu.memory_space<vmem>>) attributes {dimension_semantics = [#tpu.dimension_semantics<parallel>], iteration_bounds = array<i64: 2>, scalar_prefetch = 0 : i64, scratch_operands = 0 : i64, tpu.core_type = #tpu.core_type<tc>, window_params = [{transform_indices = @transform_0, window_bounds = array<i64: 3, 128>}, {transform_indices = @transform_1, window_bounds = array<i64: 3, 128>}, {pipeline_mode = #tpu.pipeline_mode<synchronous>, transform_indices = @transform_2, window_bounds = array<i64: 32, 3>}, {pipeline_mode = #tpu.pipeline_mode<synchronous>, transform_indices = @transform_3, window_bounds = array<i64: 32, 1>}, {pipeline_mode = #tpu.pipeline_mode<synchronous>, transform_indices = @transform_4, window_bounds = array<i64: 32, 32>}, {pipeline_mode = #tpu.pipeline_mode<synchronous>, transform_indices = @transform_5, window_bounds = array<i64: 32, 1>}, {pipeline_mode = #tpu.pipeline_mode<synchronous>, transform_indices = @transform_6, window_bounds = array<i64: 4, 32>}, {pipeline_mode = #tpu.pipeline_mode<synchronous>, transform_indices = @transform_7, window_bounds = array<i64: 4, 1>}, {transform_indices = @transform_8, window_bounds = array<i64: 3, 128>}]} {
    %c0 = arith.constant 0 : index
    %c0_0 = arith.constant 0 : index
    %0 = vector.load %arg1[%c0, %c0_0] : memref<3x128xf32, #tpu.memory_space<vmem>>, vector<3x128xf32>
    %c0_1 = arith.constant 0 : index
    %c0_2 = arith.constant 0 : index
    %1 = vector.load %arg2[%c0_1, %c0_2] : memref<3x128xf32, #tpu.memory_space<vmem>>, vector<3x128xf32>
    %cst = arith.constant 2.250000e+00 : f32
    %2 = vector.broadcast %cst : f32 to vector<3x128xf32>
    %3 = arith.mulf %1, %2 : vector<3x128xf32>
    %4 = arith.addf %0, %3 : vector<3x128xf32>
    %cst_3 = arith.constant 2.750000e+00 : f32
    %5 = vector.broadcast %cst_3 : f32 to vector<3x128xf32>
    %6 = arith.mulf %1, %5 : vector<3x128xf32>
    %7 = arith.addf %0, %6 : vector<3x128xf32>
    %cst_4 = arith.constant 3.250000e+00 : f32
    %8 = vector.broadcast %cst_4 : f32 to vector<3x128xf32>
    %9 = arith.mulf %1, %8 : vector<3x128xf32>
    %10 = arith.addf %0, %9 : vector<3x128xf32>
    %cst_5 = arith.constant 3.750000e+00 : f32
    %11 = vector.broadcast %cst_5 : f32 to vector<3x128xf32>
    %12 = arith.mulf %1, %11 : vector<3x128xf32>
    %13 = arith.addf %0, %12 : vector<3x128xf32>
    %cst_6 = arith.constant 4.250000e+00 : f32
    %14 = vector.broadcast %cst_6 : f32 to vector<3x128xf32>
    %15 = arith.mulf %1, %14 : vector<3x128xf32>
    %16 = arith.addf %0, %15 : vector<3x128xf32>
    %cst_7 = arith.constant 4.750000e+00 : f32
    %17 = vector.broadcast %cst_7 : f32 to vector<3x128xf32>
    %18 = arith.mulf %1, %17 : vector<3x128xf32>
    %19 = arith.addf %0, %18 : vector<3x128xf32>
    %cst_8 = arith.constant 5.250000e+00 : f32
    %20 = vector.broadcast %cst_8 : f32 to vector<3x128xf32>
    %21 = arith.mulf %1, %20 : vector<3x128xf32>
    %22 = arith.addf %0, %21 : vector<3x128xf32>
    %cst_9 = arith.constant 5.750000e+00 : f32
    %23 = vector.broadcast %cst_9 : f32 to vector<3x128xf32>
    %24 = arith.mulf %1, %23 : vector<3x128xf32>
    %25 = arith.addf %0, %24 : vector<3x128xf32>
    %26 = tpu.concatenate %4, %7, %10, %13, %16, %19, %22, %25 in 1 : vector<3x128xf32>, vector<3x128xf32>, vector<3x128xf32>, vector<3x128xf32>, vector<3x128xf32>, vector<3x128xf32>, vector<3x128xf32>, vector<3x128xf32> -> vector<3x1024xf32>
    %c0_10 = arith.constant 0 : index
    %c0_11 = arith.constant 0 : index
    %27 = vector.load %arg3[%c0_10, %c0_11] : memref<32x3xbf16, #tpu.memory_space<vmem>>, vector<32x3xbf16>
    %28 = arith.truncf %26 : vector<3x1024xf32> to vector<3x1024xbf16>
    %cst_12 = arith.constant dense<0.000000e+00> : vector<32x1024xf32>
    %29 = tpu.matmul %27, %28, %cst_12 {dimension_numbers = #tpu.dot_dimension_numbers<[1], [0], [0], [1], [0, 0, 1, 1], [], []>} : vector<32x3xbf16>, vector<3x1024xbf16>, vector<32x1024xf32> -> vector<32x1024xf32>
    %c0_13 = arith.constant 0 : index
    %c0_14 = arith.constant 0 : index
    %30 = vector.load %arg4[%c0_13, %c0_14] : memref<32x1xf32, #tpu.memory_space<vmem>>, vector<32x1xf32>
    %31 = vector.broadcast %30 : vector<32x1xf32> to vector<32x1024xf32>
    %32 = arith.addf %29, %31 : vector<32x1024xf32>
    %cst_15 = arith.constant 0.000000e+00 : f32
    %33 = vector.broadcast %cst_15 : f32 to vector<32x1024xf32>
    %34 = arith.maximumf %32, %33 : vector<32x1024xf32>
    %c0_16 = arith.constant 0 : index
    %c0_17 = arith.constant 0 : index
    %35 = vector.load %arg5[%c0_16, %c0_17] : memref<32x32xbf16, #tpu.memory_space<vmem>>, vector<32x32xbf16>
    %36 = arith.truncf %34 : vector<32x1024xf32> to vector<32x1024xbf16>
    %cst_18 = arith.constant dense<0.000000e+00> : vector<32x1024xf32>
    %37 = tpu.matmul %35, %36, %cst_18 {dimension_numbers = #tpu.dot_dimension_numbers<[1], [0], [0], [1], [0, 0, 1, 1], [], []>} : vector<32x32xbf16>, vector<32x1024xbf16>, vector<32x1024xf32> -> vector<32x1024xf32>
    %c0_19 = arith.constant 0 : index
    %c0_20 = arith.constant 0 : index
    %38 = vector.load %arg6[%c0_19, %c0_20] : memref<32x1xf32, #tpu.memory_space<vmem>>, vector<32x1xf32>
    %39 = vector.broadcast %38 : vector<32x1xf32> to vector<32x1024xf32>
    %40 = arith.addf %37, %39 : vector<32x1024xf32>
    %cst_21 = arith.constant 0.000000e+00 : f32
    %41 = vector.broadcast %cst_21 : f32 to vector<32x1024xf32>
    %42 = arith.maximumf %40, %41 : vector<32x1024xf32>
    %c0_22 = arith.constant 0 : index
    %c0_23 = arith.constant 0 : index
    %43 = vector.load %arg7[%c0_22, %c0_23] : memref<4x32xbf16, #tpu.memory_space<vmem>>, vector<4x32xbf16>
    %44 = arith.truncf %42 : vector<32x1024xf32> to vector<32x1024xbf16>
    %cst_24 = arith.constant dense<0.000000e+00> : vector<4x1024xf32>
    %45 = tpu.matmul %43, %44, %cst_24 {dimension_numbers = #tpu.dot_dimension_numbers<[1], [0], [0], [1], [0, 0, 1, 1], [], []>} : vector<4x32xbf16>, vector<32x1024xbf16>, vector<4x1024xf32> -> vector<4x1024xf32>
    %c0_25 = arith.constant 0 : index
    %c0_26 = arith.constant 0 : index
    %46 = vector.load %arg8[%c0_25, %c0_26] : memref<4x1xf32, #tpu.memory_space<vmem>>, vector<4x1xf32>
    %47 = vector.broadcast %46 : vector<4x1xf32> to vector<4x1024xf32>
    %48 = arith.addf %45, %47 : vector<4x1024xf32>
    %49 = vector.extract_strided_slice %48 {offsets = [3, 0], sizes = [1, 1024], strides = [1, 1]} : vector<4x1024xf32> to vector<1x1024xf32>
    %cst_27 = arith.constant 0.000000e+00 : f32
    %50 = vector.broadcast %cst_27 : f32 to vector<1x1024xf32>
    %51 = arith.maximumf %49, %50 : vector<1x1024xf32>
    %52 = vector.extract_strided_slice %48 {offsets = [0, 0], sizes = [3, 1024], strides = [1, 1]} : vector<4x1024xf32> to vector<3x1024xf32>
    %53 = arith.negf %52 : vector<3x1024xf32>
    %54 = math.exp %53 : vector<3x1024xf32>
    %cst_28 = arith.constant 1.000000e+00 : f32
    %55 = vector.broadcast %cst_28 : f32 to vector<3x1024xf32>
    %56 = arith.addf %55, %54 : vector<3x1024xf32>
    %57 = arith.divf %55, %56 : vector<3x1024xf32>
    %cst_29 = arith.constant 0.000000e+00 : f32
    %58 = vector.broadcast %cst_29 : f32 to vector<1x1024xf32>
    %59 = arith.subf %58, %51 : vector<1x1024xf32>
    %cst_30 = arith.constant 5.000000e-01 : f32
    %60 = vector.broadcast %cst_30 : f32 to vector<1x1024xf32>
    %61 = arith.mulf %59, %60 : vector<1x1024xf32>
    %62 = math.exp %61 : vector<1x1024xf32>
    %cst_31 = arith.constant 1.000000e+00 : f32
    %63 = vector.broadcast %cst_31 : f32 to vector<1x1024xf32>
    %64 = arith.subf %63, %62 : vector<1x1024xf32>
    %cst_32 = arith.constant 1.000000e+00 : f32
    %65 = vector.broadcast %cst_32 : f32 to vector<1x128xf32>
    %cst_33 = arith.constant 0.000000e+00 : f32
    %66 = vector.broadcast %cst_33 : f32 to vector<3x128xf32>
    %67 = vector.extract_strided_slice %64 {offsets = [0, 0], sizes = [1, 128], strides = [1, 1]} : vector<1x1024xf32> to vector<1x128xf32>
    %68 = vector.extract_strided_slice %57 {offsets = [0, 0], sizes = [3, 128], strides = [1, 1]} : vector<3x1024xf32> to vector<3x128xf32>
    %69 = arith.mulf %67, %65 : vector<1x128xf32>
    %70 = vector.broadcast %69 : vector<1x128xf32> to vector<3x128xf32>
    %71 = arith.mulf %70, %68 : vector<3x128xf32>
    %72 = arith.addf %66, %71 : vector<3x128xf32>
    %cst_34 = arith.constant 1.000000e+00 : f32
    %73 = vector.broadcast %cst_34 : f32 to vector<1x128xf32>
    %74 = arith.subf %73, %67 : vector<1x128xf32>
    %cst_35 = arith.constant 1.000000e-10 : f32
    %75 = vector.broadcast %cst_35 : f32 to vector<1x128xf32>
    %76 = arith.addf %74, %75 : vector<1x128xf32>
    %77 = arith.mulf %65, %76 : vector<1x128xf32>
    %78 = vector.extract_strided_slice %64 {offsets = [0, 128], sizes = [1, 128], strides = [1, 1]} : vector<1x1024xf32> to vector<1x128xf32>
    %79 = vector.extract_strided_slice %57 {offsets = [0, 128], sizes = [3, 128], strides = [1, 1]} : vector<3x1024xf32> to vector<3x128xf32>
    %80 = arith.mulf %78, %77 : vector<1x128xf32>
    %81 = vector.broadcast %80 : vector<1x128xf32> to vector<3x128xf32>
    %82 = arith.mulf %81, %79 : vector<3x128xf32>
    %83 = arith.addf %72, %82 : vector<3x128xf32>
    %cst_36 = arith.constant 1.000000e+00 : f32
    %84 = vector.broadcast %cst_36 : f32 to vector<1x128xf32>
    %85 = arith.subf %84, %78 : vector<1x128xf32>
    %cst_37 = arith.constant 1.000000e-10 : f32
    %86 = vector.broadcast %cst_37 : f32 to vector<1x128xf32>
    %87 = arith.addf %85, %86 : vector<1x128xf32>
    %88 = arith.mulf %77, %87 : vector<1x128xf32>
    %89 = vector.extract_strided_slice %64 {offsets = [0, 256], sizes = [1, 128], strides = [1, 1]} : vector<1x1024xf32> to vector<1x128xf32>
    %90 = vector.extract_strided_slice %57 {offsets = [0, 256], sizes = [3, 128], strides = [1, 1]} : vector<3x1024xf32> to vector<3x128xf32>
    %91 = arith.mulf %89, %88 : vector<1x128xf32>
    %92 = vector.broadcast %91 : vector<1x128xf32> to vector<3x128xf32>
    %93 = arith.mulf %92, %90 : vector<3x128xf32>
    %94 = arith.addf %83, %93 : vector<3x128xf32>
    %cst_38 = arith.constant 1.000000e+00 : f32
    %95 = vector.broadcast %cst_38 : f32 to vector<1x128xf32>
    %96 = arith.subf %95, %89 : vector<1x128xf32>
    %cst_39 = arith.constant 1.000000e-10 : f32
    %97 = vector.broadcast %cst_39 : f32 to vector<1x128xf32>
    %98 = arith.addf %96, %97 : vector<1x128xf32>
    %99 = arith.mulf %88, %98 : vector<1x128xf32>
    %100 = vector.extract_strided_slice %64 {offsets = [0, 384], sizes = [1, 128], strides = [1, 1]} : vector<1x1024xf32> to vector<1x128xf32>
    %101 = vector.extract_strided_slice %57 {offsets = [0, 384], sizes = [3, 128], strides = [1, 1]} : vector<3x1024xf32> to vector<3x128xf32>
    %102 = arith.mulf %100, %99 : vector<1x128xf32>
    %103 = vector.broadcast %102 : vector<1x128xf32> to vector<3x128xf32>
    %104 = arith.mulf %103, %101 : vector<3x128xf32>
    %105 = arith.addf %94, %104 : vector<3x128xf32>
    %cst_40 = arith.constant 1.000000e+00 : f32
    %106 = vector.broadcast %cst_40 : f32 to vector<1x128xf32>
    %107 = arith.subf %106, %100 : vector<1x128xf32>
    %cst_41 = arith.constant 1.000000e-10 : f32
    %108 = vector.broadcast %cst_41 : f32 to vector<1x128xf32>
    %109 = arith.addf %107, %108 : vector<1x128xf32>
    %110 = arith.mulf %99, %109 : vector<1x128xf32>
    %111 = vector.extract_strided_slice %64 {offsets = [0, 512], sizes = [1, 128], strides = [1, 1]} : vector<1x1024xf32> to vector<1x128xf32>
    %112 = vector.extract_strided_slice %57 {offsets = [0, 512], sizes = [3, 128], strides = [1, 1]} : vector<3x1024xf32> to vector<3x128xf32>
    %113 = arith.mulf %111, %110 : vector<1x128xf32>
    %114 = vector.broadcast %113 : vector<1x128xf32> to vector<3x128xf32>
    %115 = arith.mulf %114, %112 : vector<3x128xf32>
    %116 = arith.addf %105, %115 : vector<3x128xf32>
    %cst_42 = arith.constant 1.000000e+00 : f32
    %117 = vector.broadcast %cst_42 : f32 to vector<1x128xf32>
    %118 = arith.subf %117, %111 : vector<1x128xf32>
    %cst_43 = arith.constant 1.000000e-10 : f32
    %119 = vector.broadcast %cst_43 : f32 to vector<1x128xf32>
    %120 = arith.addf %118, %119 : vector<1x128xf32>
    %121 = arith.mulf %110, %120 : vector<1x128xf32>
    %122 = vector.extract_strided_slice %64 {offsets = [0, 640], sizes = [1, 128], strides = [1, 1]} : vector<1x1024xf32> to vector<1x128xf32>
    %123 = vector.extract_strided_slice %57 {offsets = [0, 640], sizes = [3, 128], strides = [1, 1]} : vector<3x1024xf32> to vector<3x128xf32>
    %124 = arith.mulf %122, %121 : vector<1x128xf32>
    %125 = vector.broadcast %124 : vector<1x128xf32> to vector<3x128xf32>
    %126 = arith.mulf %125, %123 : vector<3x128xf32>
    %127 = arith.addf %116, %126 : vector<3x128xf32>
    %cst_44 = arith.constant 1.000000e+00 : f32
    %128 = vector.broadcast %cst_44 : f32 to vector<1x128xf32>
    %129 = arith.subf %128, %122 : vector<1x128xf32>
    %cst_45 = arith.constant 1.000000e-10 : f32
    %130 = vector.broadcast %cst_45 : f32 to vector<1x128xf32>
    %131 = arith.addf %129, %130 : vector<1x128xf32>
    %132 = arith.mulf %121, %131 : vector<1x128xf32>
    %133 = vector.extract_strided_slice %64 {offsets = [0, 768], sizes = [1, 128], strides = [1, 1]} : vector<1x1024xf32> to vector<1x128xf32>
    %134 = vector.extract_strided_slice %57 {offsets = [0, 768], sizes = [3, 128], strides = [1, 1]} : vector<3x1024xf32> to vector<3x128xf32>
    %135 = arith.mulf %133, %132 : vector<1x128xf32>
    %136 = vector.broadcast %135 : vector<1x128xf32> to vector<3x128xf32>
    %137 = arith.mulf %136, %134 : vector<3x128xf32>
    %138 = arith.addf %127, %137 : vector<3x128xf32>
    %cst_46 = arith.constant 1.000000e+00 : f32
    %139 = vector.broadcast %cst_46 : f32 to vector<1x128xf32>
    %140 = arith.subf %139, %133 : vector<1x128xf32>
    %cst_47 = arith.constant 1.000000e-10 : f32
    %141 = vector.broadcast %cst_47 : f32 to vector<1x128xf32>
    %142 = arith.addf %140, %141 : vector<1x128xf32>
    %143 = arith.mulf %132, %142 : vector<1x128xf32>
    %144 = vector.extract_strided_slice %64 {offsets = [0, 896], sizes = [1, 128], strides = [1, 1]} : vector<1x1024xf32> to vector<1x128xf32>
    %145 = vector.extract_strided_slice %57 {offsets = [0, 896], sizes = [3, 128], strides = [1, 1]} : vector<3x1024xf32> to vector<3x128xf32>
    %146 = arith.mulf %144, %143 : vector<1x128xf32>
    %147 = vector.broadcast %146 : vector<1x128xf32> to vector<3x128xf32>
    %148 = arith.mulf %147, %145 : vector<3x128xf32>
    %149 = arith.addf %138, %148 : vector<3x128xf32>
    %c0_48 = arith.constant 0 : index
    %c0_49 = arith.constant 0 : index
    %150 = vector.load %arg9[%c0_48, %c0_49] : memref<3x128xf32, #tpu.memory_space<vmem>>, vector<3x128xf32>
    tpu.vector_store %arg9[%c0_48, %c0_49], %149 {strides = array<i32>} : memref<3x128xf32, #tpu.memory_space<vmem>>, vector<3x128xf32>,
    return
  }
  func.func @transform_0(%arg0: i32) -> (i32, i32) {
    %c0_i32 = arith.constant 0 : i32
    %c0_i32_0 = arith.constant 0 : i32
    return %c0_i32, %arg0 : i32, i32
  }
  func.func @transform_1(%arg0: i32) -> (i32, i32) {
    %c0_i32 = arith.constant 0 : i32
    %c0_i32_0 = arith.constant 0 : i32
    return %c0_i32, %arg0 : i32, i32
  }
  func.func @transform_2(%arg0: i32) -> (i32, i32) {
    %c0_i32 = arith.constant 0 : i32
    %c0_i32_0 = arith.constant 0 : i32
    %c0_i32_1 = arith.constant 0 : i32
    return %c0_i32, %c0_i32_0 : i32, i32
  }
  func.func @transform_3(%arg0: i32) -> (i32, i32) {
    %c0_i32 = arith.constant 0 : i32
    %c0_i32_0 = arith.constant 0 : i32
    %c0_i32_1 = arith.constant 0 : i32
    return %c0_i32, %c0_i32_0 : i32, i32
  }
  func.func @transform_4(%arg0: i32) -> (i32, i32) {
    %c0_i32 = arith.constant 0 : i32
    %c0_i32_0 = arith.constant 0 : i32
    %c0_i32_1 = arith.constant 0 : i32
    return %c0_i32, %c0_i32_0 : i32, i32
  }
  func.func @transform_5(%arg0: i32) -> (i32, i32) {
    %c0_i32 = arith.constant 0 : i32
    %c0_i32_0 = arith.constant 0 : i32
    %c0_i32_1 = arith.constant 0 : i32
    return %c0_i32, %c0_i32_0 : i32, i32
  }
  func.func @transform_6(%arg0: i32) -> (i32, i32) {
    %c0_i32 = arith.constant 0 : i32
    %c0_i32_0 = arith.constant 0 : i32
    %c0_i32_1 = arith.constant 0 : i32
    return %c0_i32, %c0_i32_0 : i32, i32
  }
  func.func @transform_7(%arg0: i32) -> (i32, i32) {
    %c0_i32 = arith.constant 0 : i32
    %c0_i32_0 = arith.constant 0 : i32
    %c0_i32_1 = arith.constant 0 : i32
    return %c0_i32, %c0_i32_0 : i32, i32
  }
  func.func @transform_8(%arg0: i32) -> (i32, i32) {
    %c0_i32 = arith.constant 0 : i32
    %c0_i32_0 = arith.constant 0 : i32
    return %c0_i32, %arg0 : i32, i32
  }
}

</mosaic_0001>

<bundles_post_ra>
// kernel: tpu_custom_call.1
= control target key start
LH: loop header
LB: loop body
LE: loop exit
PB: predicated region body
PF: predicated region fallthrough
CT: control target
= control target key end

     0   :  { %13 = vsyncpa [#allocation3], 0  ;;  %s1944_s0 = inlined_call_operand.vmem [shape: f32[3,256], index: 0, kind: input, shape index: {}]   ;;  %s1945_s1 = inlined_call_operand.vmem [shape: f32[3,256], index: 1, kind: input, shape index: {}]   ;;  %s1946_s2 = inlined_call_operand.vmem [shape: bf16[32,3], index: 2, kind: input, shape index: {}]   ;;  %s1947_s3 = inlined_call_operand.vmem [shape: f32[32,1], index: 3, kind: input, shape index: {}]   ;;  %s1948_s4 = inlined_call_operand.vmem [shape: bf16[32,32], index: 4, kind: input, shape index: {}]   ;;  %s1949_s5 = inlined_call_operand.vmem [shape: f32[32,1], index: 5, kind: input, shape index: {}]   ;;  %s1950_s6 = inlined_call_operand.vmem [shape: bf16[4,32], index: 6, kind: input, shape index: {}]   ;;  %s1951_s7 = inlined_call_operand.vmem [shape: f32[4,1], index: 7, kind: input, shape index: {}]   ;;  %s1952_s8 = inlined_call_operand.hbm [shape: f32[3,256], index: 8, kind: output, shape index: {}]  }
   0x1   :  { %15 = vsyncpa [#allocation3 + $0x1], 0  ;;  %s1662_s27 = smov 0   ;;  %s1664_s28 = smov 0  }
   0x2   :  { %s1666_s29 = smov 0   ;;  %s1668_s30 = smov 0  }
   0x3 LB: > { %s1683_s9 = sadd.s32 4294967295, %s1612_s30   ;;  %s1414_s10 = sadd.s32 4294967294, %s1612_s30   ;;  %s1612_s30 = sphi %s1668_s30, %s1960_s30   ;;  %s1608_s29 = sphi %s1666_s29, %s1959_s29   ;;  %s1604_s28 = sphi %s1664_s28, %s1958_s28   ;;  %s1600_s27 = sphi %s1662_s27, %s1957_s27  }
   0x4   : > { %s1687_s11 = sadd.s32 1, %s1612_s30   ;;  %s206_s12 = sadd.s32 1, %s1608_s29 }
   0x5   : > { %s203_s13 = ssub.s32 %s1612_s30, %s1687_s11  ;;  %p216_p0 = scmp.ne.s32.totalorder %s1608_s29, %s1604_s28 }
   0x6   : > { %p204_p1 = scmp.eq.s32.totalorder %s203_s13, 0  ;;  %p217_p2 = scmp.eq.s32.totalorder %s1683_s9, 1 }
   0x7   : > { %p222_p3 = scmp.ne.s32.totalorder %s1604_s28, %s1600_s27  ;;  %p223_p4 = scmp.eq.s32.totalorder %s1414_s10, 1 }
   0x8   : > { %s1698_s14 = scalar_select %p204_p1, %s1608_s29, %s206_s12  }
   0x9   : > { %p1700_p5 = por %p217_p2, %p216_p0  ;;  %p1704_p6 = por %p223_p4, %p222_p3 }
   0xa   : > { %1953 = sst [smem:[#allocation5_spill]] %s1698_s14  ;;  %p1417_p7 = scmp.ge.s32.totalorder %s1612_s30, 1 }
   0xb   : > { %p273_p8 = scmp.lt.s32.totalorder %s1612_s30, 3 }
   0xd   : > { %p274_p9 = pnand %p1417_p7, %p273_p8 }
   0xe   : > { %p310_p10 = scmp.lt.s32.totalorder (!%p274_p9), %s1683_s9, 1  ;;  %s307_s24 = sand.u32 (!%p274_p9), 1, %s1604_s28  }
   0xf   : > { %277 = sbr.rel (%p274_p9) target bundleno = 750 (0x2ee), region = 52  ;;  %s1454_s26 = sshll.u32 (!%p274_p9), %s1683_s9, 6 }
  0x10   : > { %s1341_s18 = scalar_lea.hbm (!%p274_p9), %s1952_s8, %s1454_s26  ;;  %s1330_s14 = scalar_lea.sflag (!%p274_p9), [#allocation3], %s307_s24 }
  0x14   : > { %vm390_vm0 = vcmask 1040384   ;;  %v1614_v0 = vmov 0   ;;  %s311_s17 = scalar_select %p310_p10, %s1683_s9, 1  ;;  %vm391_vm1 = vcmask 1041408   ;;  %v1615_v1 = vmov 65535   ;;  %v351_v3 = vld [vmem:[%s1947_s3 + $0x10] sm:$0xff] }
  0x15   : > { %450 = vmatprep.mubr.bf16.mxu0 %v1614_v0  ;;  %503 = vmatprep.mubr.bf16.mxu1 %v1614_v0  ;;  %v392_v2 = vsel %vm390_vm0, 4294967295, %v1615_v1  ;;  %v349_v4 = vld [vmem:[%s1947_s3] sm:$0xff]  ;;  %v352_v5 = vld [vmem:[%s1947_s3 + $0x18] sm:$0xff]  ;;  %v350_v9 = vld [vmem:[%s1947_s3 + $0x8] sm:$0xff]  ;;  %vm383_vm2 = vcmask 23552   ;;  %vm716_vm3 = vcmask 261120  }
  0x16   : > { %1498 = vset.pattern.permute.xlu0 %v1614_v0  ;;  %1499 = vset.pattern.permute.xlu1 %v1614_v0  ;;  %s1419_s20 = sshll.u32 %s311_s17, 2  ;;  %v393_v8 = vsel %vm391_vm1, %v392_v2, 0  ;;  %v684_v22 = vld [vmem:[%s1949_s5 + $0x10] sm:$0xff]  ;;  %v685_v27 = vld [vmem:[%s1949_s5 + $0x18] sm:$0xff]  ;;  %v1500_v42 = vld [vmem:[%s1946_s2] sm:$0xff]  }
  0x17   : > { %365 = vperm.xlu0 %1498, %v351_v3   ;;  %s313_s25 = scalar_lea.vmem %s1944_s0, %s1419_s20  ;;  %s317_s12 = scalar_lea.vmem %s1945_s1, %s1419_s20  ;;  %355 = vperm.xlu1 %1499, %v349_v4   ;;  %v682_v43 = vld [vmem:[%s1949_s5] sm:$0xff]  ;;  %v683_v44 = vld [vmem:[%s1949_s5 + $0x8] sm:$0xff] }
  0x18   : > { %v319_v6 = vld [vmem:[%s313_s25] sm:$0x7]  ;;  %v1501_v48 = vld [vmem:[%s1946_s2 + $0x8] sm:$0xff]   ;;  %s1418_s25 = sshll.u32 %s307_s24, 2  ;;  %s1616_s20 = smov [#allocation2]  }
  0x19   : > { %v320_v7 = vld [vmem:[%s317_s12] sm:$0x7]  ;;  %s309_s10 = scalar_lea.vmem [#allocation2], %s1418_s25  ;;  %s1556_s21 = sshll.u32 %s1616_s20, 4  ;;  %s1557_s21 = int_to_ptr.vmem [resolvable:$false] %s1556_s21 }
  0x1a   : > { %v323_v10 = vmul.f32 2.75, %v320_v7  ;;  %v327_v11 = vmul.f32 3.75, %v320_v7  ;;  %v321_v12 = vmul.f32 2.25, %v320_v7  ;;  %v325_v13 = vmul.f32 3.25, %v320_v7  ;;  %v984_v47 = vld [vmem:[%s1951_s7] sm:$0xf] }
  0x1b   : > { %v331_v14 = vmul.f32 4.75, %v320_v7  ;;  %v329_v15 = vmul.f32 4.25, %v320_v7  ;;  %v335_v16 = vmul.f32 5.75, %v320_v7  ;;  %v333_v17 = vmul.f32 5.25, %v320_v7  ;;  %370 = vperm.xlu0 %1498, %v352_v5   ;;  %360 = vperm.xlu1 %1499, %v350_v9   ;;  %s1343_s12 = sshll.u32 %s309_s10, 4  ;;  %s1558_s9 = scalar_lea.vmem %s1557_s21, 128  ;;  %s1344_s12 = int_to_ptr.vmem [resolvable:$true] %s1343_s12 }
  0x1c   : > { %v324_v18 = vadd.f32 %v323_v10, %v319_v6  ;;  %v328_v19 = vadd.f32 %v327_v11, %v319_v6  ;;  %v322_v20 = vadd.f32 %v321_v12, %v319_v6  ;;  %v326_v21 = vadd.f32 %v325_v13, %v319_v6  ;;  %s1552_s19 = scalar_lea.vmem %s1344_s12, 64  ;;  %p1559_p0 = scmp.lt.s32.totalorder %s1344_s12, %s1557_s21 }
  0x1d   : > { %v332_v23 = vadd.f32 %v331_v14, %v319_v6  ;;  %v330_v24 = vadd.f32 %v329_v15, %v319_v6  ;;  %v336_v25 = vadd.f32 %v335_v16, %v319_v6  ;;  %v334_v26 = vadd.f32 %v333_v17, %v319_v6  ;;  %p1553_p11 = scmp.ne.s32.totalorder %s1344_s12, %s1552_s19  ;;  %p1560_p1 = scmp.lt.s32.totalorder %s1558_s9, %s1552_s19 }
  0x1e   : > { %v342_v28 = vpack.c.bf16 %v324_v18, %v324_v18  ;;  %v344_v29 = vpack.c.bf16 %v328_v19, %v328_v19  ;;  %v341_v30 = vpack.c.bf16 %v322_v20, %v322_v20  ;;  %v343_v31 = vpack.c.bf16 %v326_v21, %v326_v21 }
  0x1f   : > { %v346_v32 = vpack.c.bf16 %v332_v23, %v332_v23  ;;  %v345_v33 = vpack.c.bf16 %v330_v24, %v330_v24  ;;  %v348_v34 = vpack.c.bf16 %v336_v25, %v336_v25  ;;  %v347_v35 = vpack.c.bf16 %v334_v26, %v334_v26  ;;  %698 = vperm.xlu0 %1498, %v684_v22   ;;  %p1554_p12 = pnand %p1553_p11, %p1700_p5  ;;  %p1561_p2 = por %p1560_p1, %p1559_p0 }
  0x20   : > { %v398_v36 = vand.u32 %v393_v8, %v342_v28  ;;  %v404_v37 = vand.u32 %v393_v8, %v344_v29  ;;  %v395_v38 = vand.u32 %v393_v8, %v341_v30  ;;  %v401_v39 = vand.u32 %v393_v8, %v343_v31  ;;  %703 = vperm.xlu1 %1499, %v685_v27  }
  0x21   : > { %v410_v40 = vand.u32 %v393_v8, %v346_v32  ;;  %v416_v41 = vand.u32 %v393_v8, %v348_v34  ;;  %v407_v45 = vand.u32 %v393_v8, %v345_v33  ;;  %v413_v46 = vand.u32 %v393_v8, %v347_v35  ;;  %p1555_p13 = pneg %p1554_p12 }
  0x22   : > { %432 = vmatprep.subr.bf16.mxu0 %v398_v36  ;;  %485 = vmatprep.subr.bf16.mxu1 %v404_v37 }
  0x23   : > { %433 = vmatpush1.bf16.msra.mxu0 %v395_v38  ;;  %486 = vmatpush1.bf16.msra.mxu1 %v401_v39  ;;  %p1562_p3 = pnand %p1561_p2, %p1555_p13 }
  0x24   : > { %538 = vmatprep.subr.bf16.mxu0 %v410_v40  ;;  %591 = vmatprep.subr.bf16.mxu1 %v416_v41 }
  0x25   : > { %688 = vperm.xlu0 %1498, %v682_v43   ;;  %693 = vperm.xlu1 %1499, %v683_v44  }
  0x26   : > { %1423 = vmatmul.mubr.msk.bf16.vlgmr.msra.gmra.mxu0 %vm383_vm2, %v1500_v42  ;;  %1425 = vmatmul.mubr.msk.bf16.vlgmr.msra.gmra.mxu1 %vm383_vm2, %v1500_v42 }
  0x27   : > { %460 = vmatprep.mubr.bf16.mxu0 %v1614_v0  ;;  %513 = vmatprep.mubr.bf16.mxu1 %v1614_v0 }
  0x28   : > { %539 = vmatpush1.bf16.msra.mxu0 %v407_v45  ;;  %592 = vmatpush1.bf16.msra.mxu1 %v413_v46 }
  0x29   : > { %987 = vperm.xlu0 %1498, %v984_v47  }
  0x2e   : > { %1424 = vmatmul.mubr.msk.bf16.gmra.mxu0 %vm383_vm2, %v1501_v48  ;;  %1426 = vmatmul.mubr.msk.bf16.gmra.mxu1 %vm383_vm2, %v1501_v48 }
  0x2f   : > { %556 = vmatprep.mubr.bf16.mxu0 %v1614_v0  ;;  %609 = vmatprep.mubr.bf16.mxu1 %v1614_v0 }
  0x36   : > { %1427 = vmatmul.mubr.msk.bf16.vlgmr.msra.gmra.mxu0 %vm383_vm2, %v1500_v42  ;;  %1429 = vmatmul.mubr.msk.bf16.vlgmr.msra.gmra.mxu1 %vm383_vm2, %v1500_v42 }
  0x37   : > { %566 = vmatprep.mubr.bf16.mxu0 %v1614_v0  ;;  %619 = vmatprep.mubr.bf16.mxu1 %v1614_v0 }
  0x3e   : > { %1428 = vmatmul.mubr.msk.bf16.gmra.mxu0 %vm383_vm2, %v1501_v48  ;;  %1430 = vmatmul.mubr.msk.bf16.gmra.mxu1 %vm383_vm2, %v1501_v48 }
  0x3f   : > { %755 = vmatprep.mubr.bf16.mxu0 %v1614_v0  ;;  %808 = vmatprep.mubr.bf16.mxu1 %v1614_v0 }
  0x92   : > { %v1771_v55 = vpop.permute.xlu0 %365  ;;  %v1773_v56 = vpop.permute.xlu1 %355 }
  0x96   : > { %v1775_v63 = vpop.permute.xlu0 %370  ;;  %v1777_v1 = vpop.permute.xlu1 %360 }
  0xe6   : > { %v452_v49 = vpop.f32.mrf.mxu0  ;;  %v505_v50 = vpop.f32.mrf.mxu1 }
  0xe7   : > { %v506_v2 = vadd.f32 %v505_v50, %v1773_v56  ;;  %v453_v31 = vadd.f32 %v452_v49, %v1773_v56 }
  0xe8   : > { %v454_v51 = vpop.f32.mrf.mxu0  ;;  %v507_v52 = vpop.f32.mrf.mxu1 }
  0xe9   : > { %v455_v11 = vadd.f32 %v454_v51, %v1773_v56  ;;  %v508_v12 = vadd.f32 %v507_v52, %v1773_v56  ;;  %v632_v32 = vmax.f32 %v506_v2, 0.0  ;;  %v630_v49 = vmax.f32 %v453_v31, 0.0 }
  0xea   : > { %v456_v53 = vpop.f32.mrf.mxu0  ;;  %v509_v54 = vpop.f32.mrf.mxu1 }
  0xeb   : > { %v457_v17 = vadd.f32 %v456_v53, %v1777_v1  ;;  %v510_v18 = vadd.f32 %v509_v54, %v1777_v1  ;;  %v631_v37 = vmax.f32 %v455_v11, 0.0  ;;  %v633_v38 = vmax.f32 %v508_v12, 0.0 }
  0xec   : > { %v458_v57 = vpop.f32.mrf.mxu0  ;;  %v511_v58 = vpop.f32.mrf.mxu1 }
  0xed   : > { %v459_v3 = vadd.f32 %v458_v57, %v1777_v1  ;;  %v512_v4 = vadd.f32 %v511_v58, %v1777_v1  ;;  %v638_v41 = vmax.f32 %v457_v17, 0.0  ;;  %v640_v42 = vmax.f32 %v510_v18, 0.0  ;;  %v1802_v58 = vld [vmem:[%s1948_s4] sm:$0xff]  }
  0xee   : > { %v462_v59 = vpop.f32.mrf.mxu0  ;;  %v515_v60 = vpop.f32.mrf.mxu1 }
  0xef   : > { %v463_v13 = vadd.f32 %v462_v59, %v1771_v55  ;;  %v516_v14 = vadd.f32 %v515_v60, %v1771_v55  ;;  %v639_v21 = vmax.f32 %v459_v3, 0.0  ;;  %v641_v22 = vmax.f32 %v512_v4, 0.0 }
  0xf0   : > { %v464_v61 = vpop.f32.mrf.mxu0  ;;  %v517_v62 = vpop.f32.mrf.mxu1  ;;  %v666_v52 = vpack.c.bf16 %v638_v41, %v630_v49  ;;  %v668_v53 = vpack.c.bf16 %v640_v42, %v632_v32 }
  0xf1   : > { %v465_v7 = vadd.f32 %v464_v61, %v1771_v55  ;;  %v518_v8 = vadd.f32 %v517_v62, %v1771_v55  ;;  %v646_v33 = vmax.f32 %v463_v13, 0.0  ;;  %v648_v34 = vmax.f32 %v516_v14, 0.0 }
  0xf2   : > { %v466_v5 = vpop.f32.mrf.mxu0  ;;  %v519_v6 = vpop.f32.mrf.mxu1  ;;  %v667_v47 = vpack.c.bf16 %v639_v21, %v631_v37  ;;  %v669_v48 = vpack.c.bf16 %v641_v22, %v633_v38 }
  0xf3   : > { %v467_v9 = vadd.f32 %v466_v5, %v1775_v63  ;;  %v520_v10 = vadd.f32 %v519_v6, %v1775_v63  ;;  %v647_v27 = vmax.f32 %v465_v7, 0.0  ;;  %v649_v28 = vmax.f32 %v518_v8, 0.0 }
  0xf4   : > { %v468_v15 = vpop.f32.mrf.mxu0  ;;  %v521_v16 = vpop.f32.mrf.mxu1 }
  0xf5   : > { %v469_v19 = vadd.f32 %v468_v15, %v1775_v63  ;;  %v522_v20 = vadd.f32 %v521_v16, %v1775_v63  ;;  %v654_v23 = vmax.f32 %v467_v9, 0.0  ;;  %v656_v24 = vmax.f32 %v520_v10, 0.0 }
  0xf6   : > { %v1794_v25 = vpop.f32.mrf.mxu0  ;;  %v1796_v26 = vpop.f32.mrf.mxu1 }
  0xf7   : > { %v655_v29 = vmax.f32 %v469_v19, 0.0  ;;  %v657_v30 = vmax.f32 %v522_v20, 0.0  ;;  %v674_v43 = vpack.c.bf16 %v654_v23, %v646_v33  ;;  %v676_v44 = vpack.c.bf16 %v656_v24, %v648_v34  ;;  %v1503_v24 = vld [vmem:[%s1948_s4 + $0x8] sm:$0xff]  }
  0xf8   : > { %v560_v35 = vpop.f32.mrf.mxu0  ;;  %v613_v36 = vpop.f32.mrf.mxu1 }
  0xf9   : > { %v675_v39 = vpack.c.bf16 %v655_v29, %v647_v27  ;;  %v677_v40 = vpack.c.bf16 %v657_v30, %v649_v28  ;;  %v561_v4 = vadd.f32 %v560_v35, %v1773_v56  ;;  %v614_v7 = vadd.f32 %v613_v36, %v1773_v56 }
  0xfa   : > { %v562_v45 = vpop.f32.mrf.mxu0  ;;  %v615_v46 = vpop.f32.mrf.mxu1 }
  0xfb   : > { %735 = vmatprep.subr.bf16.mxu0 %v675_v39  ;;  %788 = vmatprep.subr.bf16.mxu1 %v677_v40  ;;  %v563_v16 = vadd.f32 %v562_v45, %v1777_v1  ;;  %v616_v17 = vadd.f32 %v615_v46, %v1777_v1  ;;  %v635_v32 = vmax.f32 %v561_v4, 0.0  ;;  %v637_v33 = vmax.f32 %v614_v7, 0.0 }
  0xfc   : > { %v564_v50 = vpop.f32.mrf.mxu0  ;;  %v617_v51 = vpop.f32.mrf.mxu1  ;;  %736 = vmatpush1.bf16.msra.mxu0 %v674_v43  ;;  %789 = vmatpush1.bf16.msra.mxu1 %v676_v44 }
  0xfd   : > { %737 = vmatprep.subr.bf16.mxu0 %v667_v47  ;;  %790 = vmatprep.subr.bf16.mxu1 %v669_v48  ;;  %v565_v8 = vadd.f32 %v564_v50, %v1777_v1  ;;  %v618_v9 = vadd.f32 %v617_v51, %v1777_v1  ;;  %v642_v34 = vmax.f32 %v563_v16, 0.0  ;;  %v644_v35 = vmax.f32 %v616_v17, 0.0  ;;  %v1845_v47 = vpop.permute.xlu1 %703  ;;  %v1847_v50 = vpop.permute.xlu0 %698 }
  0xfe   : > { %v568_v54 = vpop.f32.mrf.mxu0  ;;  %v621_v57 = vpop.f32.mrf.mxu1 }
  0xff   : > { %v569_v12 = vadd.f32 %v568_v54, %v1771_v55  ;;  %v622_v13 = vadd.f32 %v621_v57, %v1771_v55  ;;  %v643_v27 = vmax.f32 %v565_v8, 0.0  ;;  %v645_v28 = vmax.f32 %v618_v9, 0.0 }
 0x100   : > { %v570_v59 = vpop.f32.mrf.mxu0  ;;  %v623_v60 = vpop.f32.mrf.mxu1  ;;  %738 = vmatpush1.bf16.msra.mxu0 %v666_v52  ;;  %791 = vmatpush1.bf16.msra.mxu1 %v668_v53 }
 0x101   : > { %v571_v61 = vadd.f32 %v570_v59, %v1771_v55  ;;  %v624_v62 = vadd.f32 %v623_v60, %v1771_v55  ;;  %v559_v55 = vadd.f32 %v1794_v25, %v1773_v56  ;;  %v650_v29 = vmax.f32 %v569_v12, 0.0  ;;  %v1849_v57 = vpop.permute.xlu1 %693 }
 0x102   : > { %v572_v2 = vpop.f32.mrf.mxu0  ;;  %v625_v3 = vpop.f32.mrf.mxu1  ;;  %v652_v1 = vmax.f32 %v622_v13, 0.0  ;;  %v671_v25 = vpack.c.bf16 %v643_v27, %v635_v32  ;;  %v673_v38 = vpack.c.bf16 %v645_v28, %v637_v33 }
 0x103   : > { %v573_v5 = vadd.f32 %v572_v2, %v1775_v63  ;;  %v626_v6 = vadd.f32 %v625_v3, %v1775_v63  ;;  %1433 = vmatmul.mubr.msk.bf16.vlgmr.msra.gmra.mxu0 %vm716_vm3, %v1802_v58  ;;  %1435 = vmatmul.mubr.msk.bf16.vlgmr.msra.gmra.mxu1 %vm716_vm3, %v1802_v58  ;;  %v651_v18 = vmax.f32 %v571_v61, 0.0  ;;  %v653_v19 = vmax.f32 %v624_v62, 0.0  ;;  %v1853_v62 = vpop.permute.xlu0 %688 }
 0x104   : > { %v574_v10 = vpop.f32.mrf.mxu0  ;;  %v627_v11 = vpop.f32.mrf.mxu1  ;;  %765 = vmatprep.mubr.bf16.mxu0 %v1614_v0  ;;  %818 = vmatprep.mubr.bf16.mxu1 %v1614_v0 }
 0x105   : > { %v575_v14 = vadd.f32 %v574_v10, %v1775_v63  ;;  %v628_v15 = vadd.f32 %v627_v11, %v1775_v63  ;;  %v658_v20 = vmax.f32 %v573_v5, 0.0  ;;  %v660_v21 = vmax.f32 %v626_v6, 0.0 }
 0x106   : > { %v612_v63 = vadd.f32 %v1796_v26, %v1773_v56  ;;  %v634_v56 = vmax.f32 %v559_v55, 0.0 }
 0x107   : > { %v659_v22 = vmax.f32 %v575_v14, 0.0  ;;  %v661_v23 = vmax.f32 %v628_v15, 0.0  ;;  %v678_v36 = vpack.c.bf16 %v658_v20, %v650_v29  ;;  %v680_v37 = vpack.c.bf16 %v660_v21, %v652_v1 }
 0x108   : > { %v636_v26 = vmax.f32 %v612_v63, 0.0  ;;  %v670_v39 = vpack.c.bf16 %v642_v34, %v634_v56 }
 0x109   : > { %v679_v30 = vpack.c.bf16 %v659_v22, %v651_v18  ;;  %v681_v31 = vpack.c.bf16 %v661_v23, %v653_v19 }
 0x10a   : > { %v672_v40 = vpack.c.bf16 %v644_v35, %v636_v26 }
 0x10b   : > { %1434 = vmatmul.mubr.msk.bf16.gmra.mxu0 %vm716_vm3, %v1503_v24  ;;  %1436 = vmatmul.mubr.msk.bf16.gmra.mxu1 %vm716_vm3, %v1503_v24 }
 0x10c   : > { %841 = vmatprep.subr.bf16.mxu0 %v679_v30  ;;  %894 = vmatprep.subr.bf16.mxu1 %v681_v31 }
 0x10d   : > { %842 = vmatpush1.bf16.msra.mxu0 %v678_v36  ;;  %895 = vmatpush1.bf16.msra.mxu1 %v680_v37 }
 0x10e   : > { %843 = vmatprep.subr.bf16.mxu0 %v671_v25  ;;  %896 = vmatprep.subr.bf16.mxu1 %v673_v38 }
 0x10f   : > { %861 = vmatprep.mubr.bf16.mxu0 %v1614_v0  ;;  %914 = vmatprep.mubr.bf16.mxu1 %v1614_v0 }
 0x111   : > { %844 = vmatpush1.bf16.msra.mxu0 %v670_v39  ;;  %897 = vmatpush1.bf16.msra.mxu1 %v672_v40 }
 0x114   : > { %1437 = vmatmul.mubr.msk.bf16.vlgmr.msra.gmra.mxu0 %vm716_vm3, %v1802_v58  ;;  %1439 = vmatmul.mubr.msk.bf16.vlgmr.msra.gmra.mxu1 %vm716_vm3, %v1802_v58 }
 0x115   : > { %871 = vmatprep.mubr.bf16.mxu0 %v1614_v0  ;;  %924 = vmatprep.mubr.bf16.mxu1 %v1614_v0 }
 0x11c   : > { %1438 = vmatmul.mubr.msk.bf16.gmra.mxu0 %vm716_vm3, %v1503_v24  ;;  %1440 = vmatmul.mubr.msk.bf16.gmra.mxu1 %vm716_vm3, %v1503_v24 }
 0x11d   : > { %1025 = vmatprep.mubr.bf16.mxu0 %v1614_v0  ;;  %1066 = vmatprep.mubr.bf16.mxu1 %v1614_v0 }
 0x1c3   : > { %v757_v41 = vpop.f32.mrf.mxu0  ;;  %v810_v42 = vpop.f32.mrf.mxu1 }
 0x1c4   : > { %v758_v63 = vadd.f32 %v757_v41, %v1853_v62  ;;  %v811_v27 = vadd.f32 %v810_v42, %v1853_v62 }
 0x1c5   : > { %v759_v43 = vpop.f32.mrf.mxu0  ;;  %v812_v44 = vpop.f32.mrf.mxu1 }
 0x1c6   : > { %v760_v6 = vadd.f32 %v759_v43, %v1853_v62  ;;  %v813_v7 = vadd.f32 %v812_v44, %v1853_v62  ;;  %v935_v40 = vmax.f32 %v758_v63, 0.0  ;;  %v937_v41 = vmax.f32 %v811_v27, 0.0 }
 0x1c7   : > { %v761_v45 = vpop.f32.mrf.mxu0  ;;  %v814_v46 = vpop.f32.mrf.mxu1 }
 0x1c8   : > { %v762_v12 = vadd.f32 %v761_v45, %v1849_v57  ;;  %v815_v13 = vadd.f32 %v814_v46, %v1849_v57  ;;  %v936_v1 = vmax.f32 %v760_v6, 0.0  ;;  %v938_v30 = vmax.f32 %v813_v7, 0.0 }
 0x1c9   : > { %v763_v48 = vpop.f32.mrf.mxu0  ;;  %v816_v49 = vpop.f32.mrf.mxu1 }
 0x1ca   : > { %v764_v58 = vadd.f32 %v763_v48, %v1849_v57  ;;  %v817_v59 = vadd.f32 %v816_v49, %v1849_v57  ;;  %v943_v35 = vmax.f32 %v762_v12, 0.0  ;;  %v945_v36 = vmax.f32 %v815_v13, 0.0  ;;  %v967_v49 = vld [vmem:[%s1950_s6] sm:$0x3] }
 0x1cb   : > { %v767_v51 = vpop.f32.mrf.mxu0  ;;  %v820_v52 = vpop.f32.mrf.mxu1 }
 0x1cc   : > { %v768_v8 = vadd.f32 %v767_v51, %v1847_v50  ;;  %v821_v9 = vadd.f32 %v820_v52, %v1847_v50  ;;  %v944_v16 = vmax.f32 %v764_v58, 0.0  ;;  %v946_v17 = vmax.f32 %v817_v59, 0.0 }
 0x1cd   : > { %v769_v53 = vpop.f32.mrf.mxu0  ;;  %v822_v54 = vpop.f32.mrf.mxu1  ;;  %v968_v44 = vpack.c.bf16 %v943_v35, %v935_v40  ;;  %v970_v45 = vpack.c.bf16 %v945_v36, %v937_v41 }
 0x1ce   : > { %v770_v2 = vadd.f32 %v769_v53, %v1847_v50  ;;  %v823_v3 = vadd.f32 %v822_v54, %v1847_v50  ;;  %v951_v28 = vmax.f32 %v768_v8, 0.0  ;;  %v953_v29 = vmax.f32 %v821_v9, 0.0 }
 0x1cf   : > { %v771_v60 = vpop.f32.mrf.mxu0  ;;  %v824_v61 = vpop.f32.mrf.mxu1  ;;  %v969_v38 = vpack.c.bf16 %v944_v16, %v936_v1  ;;  %v971_v56 = vpack.c.bf16 %v946_v17, %v938_v30 }
 0x1d0   : > { %v772_v4 = vadd.f32 %v771_v60, %v1845_v47  ;;  %v825_v5 = vadd.f32 %v824_v61, %v1845_v47  ;;  %v952_v20 = vmax.f32 %v770_v2, 0.0  ;;  %v954_v21 = vmax.f32 %v823_v3, 0.0 }
 0x1d1   : > { %v773_v10 = vpop.f32.mrf.mxu0  ;;  %v826_v11 = vpop.f32.mrf.mxu1 }
 0x1d2   : > { %v774_v14 = vadd.f32 %v773_v10, %v1845_v47  ;;  %v827_v15 = vadd.f32 %v826_v11, %v1845_v47  ;;  %v959_v18 = vmax.f32 %v772_v4, 0.0  ;;  %v961_v19 = vmax.f32 %v825_v5, 0.0 }
 0x1d4   : > { %v960_v22 = vmax.f32 %v774_v14, 0.0  ;;  %v962_v23 = vmax.f32 %v827_v15, 0.0  ;;  %v1867_v24 = vpop.f32.mrf.mxu0  ;;  %v1869_v55 = vpop.f32.mrf.mxu1  ;;  %v976_v37 = vpack.c.bf16 %v959_v18, %v951_v28  ;;  %v978_v25 = vpack.c.bf16 %v961_v19, %v953_v29 }
 0x1d6   : > { %v977_v31 = vpack.c.bf16 %v960_v22, %v952_v20  ;;  %v979_v32 = vpack.c.bf16 %v962_v23, %v954_v21  ;;  %v865_v33 = vpop.f32.mrf.mxu0  ;;  %v918_v34 = vpop.f32.mrf.mxu1  ;;  %v917_v21 = vadd.f32 %v1869_v55, %v1853_v62 }
 0x1d7   : > { %v866_v4 = vadd.f32 %v865_v33, %v1853_v62  ;;  %v919_v5 = vadd.f32 %v918_v34, %v1853_v62  ;;  %v988_v55 = vpop.permute.xlu0 %987 }
 0x1d8   : > { %v867_v26 = vpop.f32.mrf.mxu0  ;;  %v920_v39 = vpop.f32.mrf.mxu1  ;;  %1005 = vmatprep.subr.bf16.mxu0 %v977_v31  ;;  %1046 = vmatprep.subr.bf16.mxu1 %v979_v32  ;;  %v941_v34 = vmax.f32 %v917_v21, 0.0 }
 0x1d9   : > { %1006 = vmatpush1.bf16.msra.mxu0 %v976_v37  ;;  %1047 = vmatpush1.bf16.msra.mxu1 %v978_v25  ;;  %v868_v10 = vadd.f32 %v867_v26, %v1849_v57  ;;  %v921_v11 = vadd.f32 %v920_v39, %v1849_v57  ;;  %v940_v23 = vmax.f32 %v866_v4, 0.0  ;;  %v942_v63 = vmax.f32 %v919_v5, 0.0 }
 0x1da   : > { %v869_v42 = vpop.f32.mrf.mxu0  ;;  %v922_v43 = vpop.f32.mrf.mxu1  ;;  %1007 = vmatprep.subr.bf16.mxu0 %v969_v38  ;;  %1048 = vmatprep.subr.bf16.mxu1 %v971_v56 }
 0x1db   : > { %v870_v53 = vadd.f32 %v869_v42, %v1849_v57  ;;  %v923_v54 = vadd.f32 %v922_v43, %v1849_v57  ;;  %v947_v28 = vmax.f32 %v868_v10, 0.0  ;;  %v949_v29 = vmax.f32 %v921_v11, 0.0 }
 0x1dc   : > { %v873_v46 = vpop.f32.mrf.mxu0  ;;  %v926_v48 = vpop.f32.mrf.mxu1 }
 0x1dd   : > { %1008 = vmatpush1.bf16.msra.mxu0 %v968_v44  ;;  %1049 = vmatpush1.bf16.msra.mxu1 %v970_v45  ;;  %v874_v6 = vadd.f32 %v873_v46, %v1847_v50  ;;  %v927_v7 = vadd.f32 %v926_v48, %v1847_v50  ;;  %v948_v14 = vmax.f32 %v870_v53, 0.0 }
 0x1de   : > { %v875_v51 = vpop.f32.mrf.mxu0  ;;  %v928_v52 = vpop.f32.mrf.mxu1 }
 0x1df   : > { %v876_v58 = vadd.f32 %v875_v51, %v1847_v50  ;;  %v929_v61 = vadd.f32 %v928_v52, %v1847_v50  ;;  %v864_v50 = vadd.f32 %v1867_v24, %v1853_v62  ;;  %v955_v22 = vmax.f32 %v874_v6, 0.0 }
 0x1e0   : > { %v877_v59 = vpop.f32.mrf.mxu0  ;;  %v930_v60 = vpop.f32.mrf.mxu1  ;;  %1441 = vmatmul.mubr.msk.bf16.vlgmr.msra.gmra.mxu0 %vm716_vm3, %v967_v49  ;;  %1442 = vmatmul.mubr.msk.bf16.vlgmr.msra.gmra.mxu1 %vm716_vm3, %v967_v49  ;;  %v957_v57 = vmax.f32 %v927_v7, 0.0  ;;  %v973_v31 = vpack.c.bf16 %v948_v14, %v940_v23  ;;  %v974_v24 = vpack.c.bf16 %v949_v29, %v941_v34 }
 0x1e1   : > { %v878_v2 = vadd.f32 %v877_v59, %v1845_v47  ;;  %v931_v3 = vadd.f32 %v930_v60, %v1845_v47  ;;  %1107 = vmatprep.mubr.bf16.mxu0 %v1614_v0  ;;  %1148 = vmatprep.mubr.bf16.mxu1 %v1614_v0  ;;  %v950_v0 = vmax.f32 %v923_v54, 0.0  ;;  %v956_v17 = vmax.f32 %v876_v58, 0.0 }
 0x1e2   : > { %v879_v8 = vpop.f32.mrf.mxu0  ;;  %v932_v9 = vpop.f32.mrf.mxu1  ;;  %v958_v18 = vmax.f32 %v929_v61, 0.0  ;;  %v939_v33 = vmax.f32 %v864_v50, 0.0 }
 0x1e3   : > { %v880_v12 = vadd.f32 %v879_v8, %v1845_v47  ;;  %v933_v13 = vadd.f32 %v932_v9, %v1845_v47  ;;  %v963_v15 = vmax.f32 %v878_v2, 0.0  ;;  %v965_v16 = vmax.f32 %v931_v3, 0.0 }
 0x1e4   : > { %v975_v32 = vpack.c.bf16 %v950_v0, %v942_v63  ;;  %v972_v62 = vpack.c.bf16 %v947_v28, %v939_v33 }
 0x1e5   : > { %v964_v19 = vmax.f32 %v880_v12, 0.0  ;;  %v966_v20 = vmax.f32 %v933_v13, 0.0  ;;  %v980_v1 = vpack.c.bf16 %v963_v15, %v955_v22  ;;  %v982_v30 = vpack.c.bf16 %v965_v16, %v957_v57 }
 0x1e7   : > { %v981_v27 = vpack.c.bf16 %v964_v19, %v956_v17  ;;  %v983_v47 = vpack.c.bf16 %v966_v20, %v958_v18 }
 0x1e9   : > { %1087 = vmatprep.subr.bf16.mxu0 %v981_v27  ;;  %1128 = vmatprep.subr.bf16.mxu1 %v983_v47 }
 0x1ea   : > { %1088 = vmatpush1.bf16.msra.mxu0 %v980_v1  ;;  %1129 = vmatpush1.bf16.msra.mxu1 %v982_v30 }
 0x1eb   : > { %1089 = vmatprep.subr.bf16.mxu0 %v973_v31  ;;  %1130 = vmatprep.subr.bf16.mxu1 %v975_v32 }
 0x1ee   : > { %1090 = vmatpush1.bf16.msra.mxu0 %v972_v62  ;;  %1131 = vmatpush1.bf16.msra.mxu1 %v974_v24 }
 0x1f1   : > { %1443 = vmatmul.mubr.msk.bf16.vlgmr.msra.gmra.mxu0 %vm716_vm3, %v967_v49  ;;  %1444 = vmatmul.mubr.msk.bf16.vlgmr.msra.gmra.mxu1 %vm716_vm3, %v967_v49 }
 0x2a0   : > { %v1027_v35 = vpop.f32.mrf.mxu0  ;;  %v1068_v36 = vpop.f32.mrf.mxu1 }
 0x2a1   : > { %v1028_v37 = vadd.f32 %v1027_v35, %v988_v55  ;;  %v1069_v25 = vadd.f32 %v1068_v36, %v988_v55 }
 0x2a2   : > { %v1029_v38 = vpop.f32.mrf.mxu0  ;;  %v1070_v56 = vpop.f32.mrf.mxu1 }
 0x2a3   : > { %v1157_v26 = vmax.f32 %v1028_v37, 0.0  ;;  %v1445_v39 = vmul.f32 -1.442695, %v1028_v37  ;;  %v1159_v40 = vmax.f32 %v1069_v25, 0.0  ;;  %v1447_v41 = vmul.f32 -1.442695, %v1069_v25 }
 0x2a4   : > { %v1030_v42 = vadd.f32 %v1029_v38, %v988_v55  ;;  %v1071_v43 = vadd.f32 %v1070_v56, %v988_v55  ;;  %v1031_v44 = vpop.f32.mrf.mxu0  ;;  %v1072_v45 = vpop.f32.mrf.mxu1 }
 0x2a5   : > { %1504 = vpow2.f32 %v1445_v39  ;;  %v1213_v46 = vsub.f32 0.0, %v1157_v26  ;;  %v1215_v48 = vsub.f32 0.0, %v1159_v40  ;;  %v1253_v39 = vlaneseq }
 0x2a6   : > { %1506 = vpow2.f32 %v1447_v41  ;;  %v1158_v49 = vmax.f32 %v1030_v42, 0.0  ;;  %v1446_v51 = vmul.f32 -1.442695, %v1030_v42  ;;  %v1160_v52 = vmax.f32 %v1071_v43, 0.0  ;;  %v1032_v53 = vpop.f32.mrf.mxu0  ;;  %v1073_v54 = vpop.f32.mrf.mxu1 }
 0x2a7   : > { %v1221_v58 = vmul.f32 0.5, %v1213_v46  ;;  %v1223_v59 = vmul.f32 0.5, %v1215_v48  ;;  %v1448_v4 = vmul.f32 -1.442695, %v1071_v43 }
 0x2a8   : > { %1508 = vpow2.f32 %v1446_v51  ;;  %v1214_v60 = vsub.f32 0.0, %v1158_v49  ;;  %v1216_v61 = vsub.f32 0.0, %v1160_v52  ;;  %v1254_v52 = vshrl.u32 %v1253_v39, 7 }
 0x2a9   : > { %v1229_v2 = vmul.f32 1.442695, %v1221_v58  ;;  %v1233_v3 = vmul.f32 1.442695, %v1223_v59 }
 0x2aa   : > { %v1222_v5 = vmul.f32 0.5, %v1214_v60  ;;  %v1224_v6 = vmul.f32 0.5, %v1216_v61 }
 0x2ab   : > { %1510 = vpow2.f32 %v1229_v2 }
 0x2ac   : > { %1512 = vpow2.f32 %v1233_v3  ;;  %v1231_v7 = vmul.f32 1.442695, %v1222_v5  ;;  %v1235_v8 = vmul.f32 1.442695, %v1224_v6  ;;  %v1900_v3 = vsub.s32 3, %v1254_v52 }
 0x2ad   : > { %1514 = vpow2.f32 %v1448_v4 }
 0x2ae   : > { %1516 = vpow2.f32 %v1231_v7 }
 0x2af   : > { %1518 = vpow2.f32 %v1235_v8 }
 0x2b1   : > { %v1109_v9 = vpop.f32.mrf.mxu0  ;;  %v1150_v10 = vpop.f32.mrf.mxu1 }
 0x2b2   : > { %v1505_v11 = vpop.eup %1504  ;;  %v1110_v12 = vadd.f32 %v1109_v9, %v988_v55  ;;  %v1151_v13 = vadd.f32 %v1150_v10, %v988_v55 }
 0x2b3   : > { %v1507_v14 = vpop.eup %1506  ;;  %v1189_v0 = vadd.f32 1.0, %v1505_v11  ;;  %v1111_v15 = vpop.f32.mrf.mxu0 }
 0x2b4   : > { %v1152_v16 = vpop.f32.mrf.mxu1  ;;  %v1161_v17 = vmax.f32 %v1110_v12, 0.0  ;;  %v1449_v18 = vmul.f32 -1.442695, %v1110_v12  ;;  %v1163_v19 = vmax.f32 %v1151_v13, 0.0  ;;  %v1191_v50 = vadd.f32 1.0, %v1507_v14 }
 0x2b5   : > { %v1509_v20 = vpop.eup %1508  ;;  %1520 = vrcp.f32 %v1189_v0  ;;  %v1112_v21 = vadd.f32 %v1111_v15, %v988_v55  ;;  %v1153_v22 = vadd.f32 %v1152_v16, %v988_v55  ;;  %v1113_v57 = vpop.f32.mrf.mxu0  ;;  %v1451_v47 = vmul.f32 -1.442695, %v1151_v13 }
 0x2b6   : > { %v1154_v23 = vpop.f32.mrf.mxu1  ;;  %v1190_v63 = vadd.f32 1.0, %v1509_v20  ;;  %v1217_v27 = vsub.f32 0.0, %v1161_v17  ;;  %v1219_v28 = vsub.f32 0.0, %v1163_v19  ;;  %1522 = vpow2.f32 %v1449_v18 }
 0x2b7   : > { %v1162_v29 = vmax.f32 %v1112_v21, 0.0  ;;  %v1450_v1 = vmul.f32 -1.442695, %v1112_v21  ;;  %v1114_v30 = vpop.f32.mrf.mxu0  ;;  %v1164_v62 = vmax.f32 %v1153_v22, 0.0  ;;  %v1452_v36 = vmul.f32 -1.442695, %v1153_v22 }
 0x2b8   : > { %v1155_v31 = vpop.f32.mrf.mxu1  ;;  %v1511_v32 = vpop.eup %1510  ;;  %1524 = vrcp.f32 %v1190_v63  ;;  %v1225_v33 = vmul.f32 0.5, %v1217_v27  ;;  %v1227_v34 = vmul.f32 0.5, %v1219_v28 }
 0x2b9   : > { %v1513_v24 = vpop.eup %1512  ;;  %v1245_v35 = vsub.f32 1.0, %v1511_v32  ;;  %1526 = vrcp.f32 %v1191_v50  ;;  %v1218_v55 = vsub.f32 0.0, %v1162_v29  ;;  %v1220_v43 = vsub.f32 0.0, %v1164_v62 }
 0x2ba   : > { %v1515_v37 = vpop.eup %1514  ;;  %v1247_v25 = vsub.f32 1.0, %v1513_v24  ;;  %v1237_v38 = vmul.f32 1.442695, %v1225_v33  ;;  %1528 = vpow2.f32 %v1451_v47  ;;  %v1241_v56 = vmul.f32 1.442695, %v1227_v34 }
 0x2bb   : > { %v1517_v26 = vpop.eup %1516  ;;  %v1259_v40 = vsub.f32 1.0, %v1245_v35  ;;  %1530 = vpow2.f32 %v1450_v1  ;;  %v1226_v41 = vmul.f32 0.5, %v1218_v55  ;;  %v1192_v45 = vadd.f32 1.0, %v1515_v37 }
 0x2bc   : > { %v1246_v42 = vsub.f32 1.0, %v1517_v26  ;;  %1532 = vpow2.f32 %v1237_v38  ;;  %v1278_v48 = vsub.f32 1.0, %v1247_v25  ;;  %v1228_v51 = vmul.f32 0.5, %v1220_v43  ;;  %v1519_v53 = vpop.eup %1518 }
 0x2bd   : > { %v1260_v44 = vadd.f32 1e-10, %v1259_v40  ;;  %1534 = vpow2.f32 %v1241_v56  ;;  %v1239_v46 = vmul.f32 1.442695, %v1226_v41  ;;  %v1248_v4 = vsub.f32 1.0, %v1519_v53 }
 0x2be   : > { %v1268_v49 = vsub.f32 1.0, %v1246_v42  ;;  %1536 = vpow2.f32 %v1452_v36  ;;  %v1243_v58 = vmul.f32 1.442695, %v1228_v51  ;;  %v1279_v61 = vadd.f32 1e-10, %v1278_v48 }
 0x2bf   : > { %1538 = vpow2.f32 %v1239_v46  ;;  %v1261_v59 = vmul.f32 %v1260_v44, %v1246_v42  ;;  %v1256_v13 = vrot.slane %v1245_v35, %v1900_v3  ;;  %v1288_v0 = vsub.f32 1.0, %v1248_v4 }
 0x2c0   : > { %v1269_v54 = vadd.f32 1e-10, %v1268_v49  ;;  %1540 = vrcp.f32 %v1192_v45 }
 0x2c1   : > { %1542 = vpow2.f32 %v1243_v58  ;;  %v1265_v9 = vrot.slane %v1261_v59, %v1900_v3  ;;  %v1289_v63 = vadd.f32 1e-10, %v1288_v0 }
 0x2c2   : > { %v1521_v60 = vpop.eup %1520  ;;  %v1270_v2 = vmul.f32 %v1269_v54, %v1260_v44 }
 0x2c3   : > { %v1523_v5 = vpop.eup %1522  ;;  %v1257_v20 = vmul.f32 %v1521_v60, %v1256_v13 }
 0x2c4   : > { %v1271_v6 = vmul.f32 %v1270_v2, %v1247_v25  ;;  %v1280_v7 = vmul.f32 %v1279_v61, %v1270_v2  ;;  %v1193_v10 = vadd.f32 1.0, %v1523_v5 }
 0x2c5   : > { %v1525_v8 = vpop.eup %1524 }
 0x2c6   : > { %v1527_v11 = vpop.eup %1526  ;;  %v1266_v14 = vmul.f32 %v1525_v8, %v1265_v9  ;;  %1544 = vrcp.f32 %v1193_v10  ;;  %v1275_v16 = vrot.slane %v1271_v6, %v1900_v3  ;;  %v1281_v17 = vmul.f32 %v1280_v7, %v1248_v4 }
 0x2c7   : > { %v1529_v12 = vpop.eup %1528  ;;  %v1290_v31 = vmul.f32 %v1289_v63, %v1280_v7 }
 0x2c8   : > { %v1531_v15 = vpop.eup %1530  ;;  %v1195_v18 = vadd.f32 1.0, %v1529_v12  ;;  %v1267_v23 = vadd.f32 %v1266_v14, %v1257_v20  ;;  %v1285_v28 = vrot.slane %v1281_v17, %v1900_v3  ;;  %v1276_v30 = vmul.f32 %v1527_v11, %v1275_v16 }
 0x2c9   : > { %v1533_v19 = vpop.eup %1532  ;;  %v1194_v50 = vadd.f32 1.0, %v1531_v15 }
 0x2ca   : > { %v1535_v21 = vpop.eup %1534  ;;  %v1249_v22 = vsub.f32 1.0, %v1533_v19  ;;  %1546 = vrcp.f32 %v1195_v18  ;;  %v1277_v37 = vadd.f32 %v1276_v30, %v1267_v23 }
 0x2cb   : > { %v1537_v57 = vpop.eup %1536  ;;  %v1251_v27 = vsub.f32 1.0, %v1535_v21  ;;  %1548 = vrcp.f32 %v1194_v50 }
 0x2cc   : > { %v1539_v47 = vpop.eup %1538  ;;  %v1298_v29 = vsub.f32 1.0, %v1249_v22  ;;  %v1196_v1 = vadd.f32 1.0, %v1537_v57  ;;  %v1291_v62 = vmul.f32 %v1290_v31, %v1249_v22 }
 0x2cd   : > { %v1250_v32 = vsub.f32 1.0, %v1539_v47  ;;  %v1541_v34 = vpop.eup %1540  ;;  %v1318_v24 = vsub.f32 1.0, %v1251_v27 }
 0x2ce   : > { %v1299_v33 = vadd.f32 1e-10, %v1298_v29  ;;  %1550 = vrcp.f32 %v1196_v1  ;;  %v1286_v55 = vmul.f32 %v1541_v34, %v1285_v28  ;;  %v1543_v25 = vpop.eup %1542  ;;  %v1295_v26 = vrot.slane %v1291_v62, %v1900_v3 }
 0x2cf   : > { %v1308_v35 = vsub.f32 1.0, %v1250_v32  ;;  %v1319_v39 = vadd.f32 1e-10, %v1318_v24  ;;  %v1252_v42 = vsub.f32 1.0, %v1543_v25 }
 0x2d0   : > { %v1300_v36 = vmul.f32 %v1299_v33, %v1290_v31  ;;  %v1287_v43 = vadd.f32 %v1286_v55, %v1277_v37 }
 0x2d1   : > { %v1309_v38 = vadd.f32 1e-10, %v1308_v35 }
 0x2d2   : > { %v1301_v56 = vmul.f32 %v1300_v36, %v1250_v32 }
 0x2d3   : > { %v1310_v40 = vmul.f32 %v1309_v38, %v1300_v36  ;;  %v1545_v41 = vpop.eup %1544 }
 0x2d4   : > { %v1305_v44 = vrot.slane %v1301_v56, %v1900_v3  ;;  %v1296_v46 = vmul.f32 %v1545_v41, %v1295_v26 }
 0x2d5   : > { %v1320_v45 = vmul.f32 %v1319_v39, %v1310_v40  ;;  %v1311_v48 = vmul.f32 %v1310_v40, %v1251_v27 }
 0x2d6   : > { %v1297_v52 = vadd.f32 %v1296_v46, %v1287_v43 }
 0x2d7   : > { %v1547_v49 = vpop.eup %1546  ;;  %v1321_v51 = vmul.f32 %v1320_v45, %v1252_v42  ;;  %v1315_v53 = vrot.slane %v1311_v48, %v1900_v3 }
 0x2d8   : > { %v1549_v54 = vpop.eup %1548 }
 0x2d9   : > { %v1306_v58 = vmul.f32 %v1549_v54, %v1305_v44  ;;  %v1316_v59 = vmul.f32 %v1547_v49, %v1315_v53  ;;  %v1325_v60 = vrot.slane %v1321_v51, %v1900_v3 }
 0x2db   : > { %v1551_v61 = vpop.eup %1550  ;;  %v1307_v2 = vadd.f32 %v1306_v58, %v1297_v52 }
 0x2dc   : > { %v1326_v4 = vmul.f32 %v1551_v61, %v1325_v60 }
 0x2dd   : > { %v1317_v5 = vadd.f32 %v1316_v59, %v1307_v2 }
 0x2df   : > { %v1327_v6 = vadd.f32 %v1326_v4, %v1317_v5 }
 0x2e1   : > { %1328 = vst [vmem:[%s309_s10] sm:$0x7] %v1327_v6 }
 0x2e2   : > { %1565 = shalt.err (!%p1562_p3)
}
 0x2e3   : > { %s1566_s22 = scalar_lea.hbm %s1341_s18, 64  ;;  %s1570_s25 = scalar_lea.hbm %s1952_s8, 128 }
 0x2e4   : > { %p1567_p4 = scmp.ne.s32.totalorder %s1341_s18, %s1566_s22  ;;  %p1571_p9 = scmp.lt.s32.totalorder %s1341_s18, %s1952_s8 }
 0x2e5   : > { %p1572_p10 = scmp.lt.s32.totalorder %s1570_s25, %s1566_s22 }
 0x2e6   : > { %p1568_p7 = pnand %p1567_p4, %p1700_p5 }
 0x2e7   : > { %p1573_p11 = por %p1572_p10, %p1571_p9 }
 0x2e8   : > { %p1569_p8 = pneg %p1568_p7 }
 0x2ea   : > { %p1574_p12 = pnand %p1573_p11, %p1569_p8 }
 0x2ec   : > { %1577 = shalt.err (!%p1574_p12)
}
 0x2ed   : > { %1457 = dma.vmem_to_hbm [thread:$0]  (%p1700_p5), %s1344_s12, 64, %s1341_s18, %s1330_s14  }
 0x2ee PF: > { %p1463_p13 = scmp.ge.s32.totalorder %s1612_s30, 2  ;;  %s1355_s13 = sand.u32 1, %s1600_s27  }
 0x2ef   : > { %s1356_s17 = scalar_lea.sflag [#allocation3], %s1355_s13 }
 0x2f0   : > { %p1460_p0 = pnand %p1463_p13, %p1704_p6 }
 0x2f2   : > { %p1461_p1 = pneg %p1460_p0 }
 0x2f4   : > { %1595 = dma.done.wait (%p1461_p1), %s1356_s17, 64  }
 0x2f5   : > { %1597 = vsyncadd (%p1461_p1), %s1356_s17, 4294967232  ;;  %s1956_s19 = sld [smem:[#allocation5_spill]]  ;;  %p18_p2 = scmp.ge.s32.totalorder %s1687_s11, 4  }
 0x2f6   : > { %s1957_s27 = smov %s1604_s28  ;;  %s1958_s28 = smov %s1608_s29 }
 0x2f7   : > { %s1960_s30 = smov %s1687_s11  ;;  %20 = sbr.rel (!%p18_p2) target bundleno = 3 (0x3), region = 90 }
 0x2fb   : > { %s1959_s29 = smov %s1956_s19 }
 0x2fc   :  { %1361 = vsyncpa [#allocation3], 1 }
 0x2fd   :  { %1363 = vsyncpa [#allocation3 + $0x1], 1 }

</bundles_post_ra>
